<compile_context>
chip_gen: v5e
topology: v5e:2x2
jax: 0.10.0
libtpu: 0.0.40
codegen_flags: <defaults>
</compile_context>

<pallas_src>
import jax
import jax.numpy as jnp
from jax.experimental import pallas as pl
from jax.experimental.pallas import tpu as pltpu


# Budget for the double-buffered input/output blocks. Conservative for v7x
# (64 MiB physical VMEM per TensorCore); ample headroom on v5e/v6e (128 MiB).
_VMEM_BLOCK_BUDGET = 40 << 20


# ----------------------------------------------------------------------------
# Pallas kernels: (tm, N) mask @ (N, td) reps, optional per-row scale
# ----------------------------------------------------------------------------
def _aggr_kernel_norm(scale_ref, mask_ref, reps_ref, out_ref):
    # scale: (1, tm, 1) f32; mask: (1, tm, N); reps: (1, N, td); out: (1, tm, td)
    acc = jnp.dot(mask_ref[0], reps_ref[0], preferred_element_type=jnp.float32)
    out_ref[0] = (acc * scale_ref[0]).astype(out_ref.dtype)


def _aggr_kernel(mask_ref, reps_ref, out_ref):
    acc = jnp.dot(mask_ref[0], reps_ref[0], preferred_element_type=jnp.float32)
    out_ref[0] = acc.astype(out_ref.dtype)


# ----------------------------------------------------------------------------
# Tile selection
# ----------------------------------------------------------------------------
def _pick_tm(M):
    if M <= 256:
        return M                       # block == full dim is always layout-legal
    for c in (256, 128, 64, 32, 16, 8):
        if M % c == 0:
            return c
    return M                           # fallback: full dim


def _block_footprint(tm, td, N, in_bytes, normalize):
    # Double-buffered mask/reps input blocks + double-buffered f32 output block
    # (+ the tiny per-row scale block, lane-padded to 128).
    f = 2 * (tm * N * in_bytes + N * td * in_bytes + tm * td * 4)
    if normalize:
        f += 2 * tm * 128 * 4
    return f


def _pick_td(N, D, tm, in_bytes, normalize, other_parallel_steps):
    if D <= 128:
        return D
    cands = [c for c in (1024, 512, 256, 128) if D % c == 0]
    if not cands:
        return D                       # no lane-aligned divisor: full-dim block
    td = cands[-1]                     # smallest aligned divisor as fallback
    for c in cands:                    # largest candidate that fits the budget
        if _block_footprint(tm, c, N, in_bytes, normalize) <= _VMEM_BLOCK_BUDGET:
            td = c
            break
    # v7x has 2 TensorCores per chip: make sure the (all-parallel) grid has at
    # least 2 steps so one core is not left idle.
    if other_parallel_steps * (D // td) < 2 and (D // 2) % 128 == 0:
        td = min(td, D // 2)
    return td


# ----------------------------------------------------------------------------
# Wrapper: (B, M, N) mask  x  (B, N, D) reps  ->  (B, M, D) f32
# ----------------------------------------------------------------------------
def _masked_aggregate(mask, reps, *, normalize):
    B, M, N = mask.shape
    Br, Nr, D = reps.shape
    assert B == Br and N == Nr, (mask.shape, reps.shape)

    # Keep reps in its native float dtype (bf16 halves the dominant HBM stream
    # and runs at native MXU rate); the 0/1 mask is exact in any float dtype.
    compute_dtype = reps.dtype if jnp.issubdtype(reps.dtype, jnp.floating) \
        else jnp.float32
    in_bytes = jnp.dtype(compute_dtype).itemsize
    mask_c = mask.astype(compute_dtype)
    reps_c = reps.astype(compute_dtype)

    tm = _pick_tm(M)
    td = _pick_td(N, D, tm, in_bytes, normalize, B * (M // tm))
    # M-tile axis innermost: reps block index is constant across consecutive
    # steps, so the big (N, td) slab stays resident instead of re-streaming.
    grid = (B, D // td, M // tm)

    footprint = _block_footprint(tm, td, N, in_bytes, normalize)
    vmem_limit = int(max(footprint + (8 << 20), 16 << 20))

    d_tiles = D // td
    bytes_accessed = (B * d_tiles * M * N * in_bytes      # mask, re-read per D tile
                      + B * N * D * in_bytes              # reps, read once
                      + B * M * D * 4)                    # f32 output
    if normalize:
        bytes_accessed += B * d_tiles * M * 4
    cost = pl.CostEstimate(flops=2 * B * M * N * D, transcendentals=0,
                           bytes_accessed=int(bytes_accessed))

    mask_spec = pl.BlockSpec((1, tm, N), lambda b, di, mi: (b, mi, 0))
    reps_spec = pl.BlockSpec((1, N, td), lambda b, di, mi: (b, 0, di))
    out_spec = pl.BlockSpec((1, tm, td), lambda b, di, mi: (b, mi, di))

    if normalize:
        # Hoisted per-row 1/count: summed in f32 so long masks keep exact
        # integer counts, then a single reciprocal per row (exact, not approx).
        counts = jnp.sum(mask.astype(jnp.float32), axis=-1, keepdims=True)
        scale = 1.0 / jnp.maximum(counts, 1.0)                 # (B, M, 1) f32
        in_specs = [pl.BlockSpec((1, tm, 1), lambda b, di, mi: (b, mi, 0)),
                    mask_spec, reps_spec]
        args = (scale, mask_c, reps_c)
        kernel = _aggr_kernel_norm
    else:
        in_specs = [mask_spec, reps_spec]
        args = (mask_c, reps_c)
        kernel = _aggr_kernel

    return pl.pallas_call(
        kernel,
        out_shape=jax.ShapeDtypeStruct((B, M, D), jnp.float32),
        grid_spec=pltpu.PrefetchScalarGridSpec(
            num_scalar_prefetch=0,
            grid=grid,
            in_specs=in_specs,
            out_specs=out_spec),
        compiler_params=pltpu.CompilerParams(
            dimension_semantics=("parallel", "parallel", "parallel"),
            vmem_limit_bytes=vmem_limit),
        cost_estimate=cost,
    )(*args)


# ----------------------------------------------------------------------------
# Mask preprocessing (pure JAX; cheap elementwise / scalar work)
# ----------------------------------------------------------------------------
def _get_context_mask(number_mask, K, include_number=False):
    # Faithful reduction of torch.einsum('bns,ss->bns', mask, |i-j|<=K): the
    # repeated 's' index selects the window's DIAGONAL (|i-i| <= K), which is
    # all-ones for K >= 0, so the whole op is the identity — no extra
    # B*M*N elementwise HBM pass is emitted.
    ctx = number_mask if K >= 0 else jnp.zeros_like(number_mask)
    if include_number:
        ctx = jnp.maximum(ctx, number_mask)
    return ctx


def _expand_window_vectorized(A, percentage):
    # Vectorised equivalent of the torch per-row loop: only rows containing
    # ones are overwritten with a contiguous [new_start, new_end] window of 1s.
    _, _, M = A.shape
    row_has_ones = A.sum(axis=-1) > 0
    first = jnp.argmax(A, axis=-1)
    last = M - 1 - jnp.argmax(A[:, :, ::-1], axis=-1)
    window = (last - first + 1).astype(jnp.float32)
    expand = (window * percentage).astype(jnp.int32)
    new_start = jnp.maximum(first - expand, 0)
    new_end = jnp.minimum(last + expand, M - 1)
    idx = jnp.arange(M)
    in_win = ((idx[None, None, :] >= new_start[..., None]) &
              (idx[None, None, :] <= new_end[..., None]))
    return jnp.where(row_has_ones[..., None] & in_win,
                     jnp.ones((), A.dtype), A)


# ----------------------------------------------------------------------------
# NumReps.forward
# ----------------------------------------------------------------------------
def num_reps_forward(number_mask, reps, aggr_mode,
                     expand_percentage=0, get_context=False):
    """number_mask: (B, max_nums, N); reps: (B, N, D). Returns (B, max_nums, D)."""
    mask = number_mask
    mode = aggr_mode
    if get_context:
        mask = _get_context_mask(number_mask, K=5)
        mode = "mean"
    if expand_percentage:
        mask = _expand_window_vectorized(number_mask.astype(jnp.float32),
                                         expand_percentage)
    if mode == "mean":
        return _masked_aggregate(mask, reps, normalize=True)
    if mode == "token":
        return _masked_aggregate(mask, reps, normalize=False)
    # TODO(synk): 'gru_l2r' / 'gru_r2l' (2-layer sequential GRU) not implemented.
    raise NotImplementedError(f"aggr_mode={mode!r} not supported in this kernel")


# ----------------------------------------------------------------------------
# Pure-JAX reference replicating the torch forward (f32 everywhere)
# ----------------------------------------------------------------------------
def _reference_forward(number_mask, reps, aggr_mode,
                       expand_percentage=0, get_context=False):
    mask = number_mask.astype(jnp.float32)
    reps32 = reps.astype(jnp.float32)
    mode = aggr_mode
    if get_context:
        mask = _get_context_mask(mask, K=5)
        mode = "mean"
    if expand_percentage:
        mask = _expand_window_vectorized(number_mask.astype(jnp.float32),
                                         expand_percentage)
    if mode == "mean":
        num_ones = mask.sum(axis=-1, keepdims=True)
        norm = mask / jnp.maximum(num_ones, 1.0)
        return jnp.einsum("bmn,bnd->bmd", norm, reps32,
                          precision=jax.lax.Precision.HIGHEST)
    if mode == "token":
        return jnp.einsum("bmn,bnd->bmd", mask, reps32,
                          precision=jax.lax.Precision.HIGHEST)
    raise NotImplementedError


if __name__ == "__main__":
    B, M, N, D = 2, 8, 128, 256   # batch, max_nums, seq_len, node_dim

    key = jax.random.PRNGKey(0)
    k_reps, k_start, k_len = jax.random.split(key, 3)

    # reps in bf16 (the realistic model dtype; also exercises the bf16 path).
    reps = jax.random.normal(k_reps, (B, N, D), jnp.float32).astype(jnp.bfloat16)

    # Contiguous per-number token windows (realistic number_mask).
    starts = jax.random.randint(k_start, (B, M), 0, N - 16)
    lens = jax.random.randint(k_len, (B, M), 1, 9)
    pos = jnp.arange(N)
    number_mask = ((pos[None, None, :] >= starts[..., None]) &
                   (pos[None, None, :] < (starts + lens)[..., None])
                   ).astype(jnp.float32)
    # One empty row per batch to exercise the clamp(min=1) path.
    number_mask = number_mask.at[:, 0, :].set(0.0)

    test_cases = (
        dict(aggr_mode="mean"),
        dict(aggr_mode="token"),
        dict(aggr_mode="token", get_context=True),       # forces 'mean'
        dict(aggr_mode="mean", expand_percentage=0.5),
    )
    for kwargs in test_cases:
        out = num_reps_forward(number_mask, reps, **kwargs)
        out = jax.block_until_ready(out)
        ref = _reference_forward(number_mask, reps, **kwargs)
        assert out.shape == (B, M, D), (out.shape, kwargs)
        assert jnp.allclose(out, ref, atol=1e-4, rtol=1e-4), kwargs

    print("KERNEL_OK")
</pallas_src>

<mosaic_0001>
module attributes {stable_mosaic.version = 11 : i64} {
  func.func @_aggr_kernel_norm(%arg0: i32, %arg1: i32, %arg2: i32, %arg3: memref<1x8x1xf32, #tpu.memory_space<vmem>>, %arg4: memref<1x8x128xbf16, #tpu.memory_space<vmem>>, %arg5: memref<1x128x256xbf16, #tpu.memory_space<vmem>>, %arg6: memref<1x8x256xf32, #tpu.memory_space<vmem>>) attributes {dimension_semantics = [#tpu.dimension_semantics<parallel>, #tpu.dimension_semantics<parallel>, #tpu.dimension_semantics<parallel>], iteration_bounds = array<i64: 2, 1, 1>, scalar_prefetch = 0 : i64, scratch_operands = 0 : i64, tpu.core_type = #tpu.core_type<tc>, window_params = [{transform_indices = @transform_0, window_bounds = array<i64: 1, 8, 1>}, {transform_indices = @transform_1, window_bounds = array<i64: 1, 8, 128>}, {transform_indices = @transform_2, window_bounds = array<i64: 1, 128, 256>}, {transform_indices = @transform_3, window_bounds = array<i64: 1, 8, 256>}]} {
    %c0 = arith.constant 0 : index
    %c0_0 = arith.constant 0 : index
    %c0_1 = arith.constant 0 : index
    %0 = vector.load %arg4[%c0, %c0_0, %c0_1] : memref<1x8x128xbf16, #tpu.memory_space<vmem>>, vector<1x8x128xbf16>
    %1 = vector.shape_cast %0 : vector<1x8x128xbf16> to vector<8x128xbf16>
    %c0_2 = arith.constant 0 : index
    %c0_3 = arith.constant 0 : index
    %c0_4 = arith.constant 0 : index
    %2 = vector.load %arg5[%c0_2, %c0_3, %c0_4] : memref<1x128x256xbf16, #tpu.memory_space<vmem>>, vector<1x128x256xbf16>
    %3 = vector.shape_cast %2 : vector<1x128x256xbf16> to vector<128x256xbf16>
    %cst = arith.constant dense<0.000000e+00> : vector<8x256xf32>
    %4 = tpu.matmul %1, %3, %cst {dimension_numbers = #tpu.dot_dimension_numbers<[1], [0], [0], [1], [0, 0, 1, 1], [], []>} : vector<8x128xbf16>, vector<128x256xbf16>, vector<8x256xf32> -> vector<8x256xf32>
    %c0_5 = arith.constant 0 : index
    %c0_6 = arith.constant 0 : index
    %c0_7 = arith.constant 0 : index
    %5 = vector.load %arg3[%c0_5, %c0_6, %c0_7] : memref<1x8x1xf32, #tpu.memory_space<vmem>>, vector<1x8x1xf32>
    %6 = vector.shape_cast %5 : vector<1x8x1xf32> to vector<8x1xf32>
    %7 = vector.broadcast %6 : vector<8x1xf32> to vector<8x256xf32>
    %8 = arith.mulf %4, %7 : vector<8x256xf32>
    %c0_8 = arith.constant 0 : index
    %c0_9 = arith.constant 0 : index
    %c0_10 = arith.constant 0 : index
    %9 = vector.load %arg6[%c0_8, %c0_9, %c0_10] : memref<1x8x256xf32, #tpu.memory_space<vmem>>, vector<1x8x256xf32>
    %10 = vector.shape_cast %9 : vector<1x8x256xf32> to vector<8x256xf32>
    %11 = vector.shape_cast %8 : vector<8x256xf32> to vector<1x8x256xf32>
    tpu.vector_store %arg6[%c0_8, %c0_9, %c0_10], %11 {strides = array<i32>} : memref<1x8x256xf32, #tpu.memory_space<vmem>>, vector<1x8x256xf32>,
    return
  }
  func.func @transform_0(%arg0: i32, %arg1: i32, %arg2: i32) -> (i32, i32, i32) {
    %c0_i32 = arith.constant 0 : i32
    %c0_i32_0 = arith.constant 0 : i32
    return %arg0, %arg2, %c0_i32 : i32, i32, i32
  }
  func.func @transform_1(%arg0: i32, %arg1: i32, %arg2: i32) -> (i32, i32, i32) {
    %c0_i32 = arith.constant 0 : i32
    %c0_i32_0 = arith.constant 0 : i32
    return %arg0, %arg2, %c0_i32 : i32, i32, i32
  }
  func.func @transform_2(%arg0: i32, %arg1: i32, %arg2: i32) -> (i32, i32, i32) {
    %c0_i32 = arith.constant 0 : i32
    %c0_i32_0 = arith.constant 0 : i32
    return %arg0, %c0_i32, %arg1 : i32, i32, i32
  }
  func.func @transform_3(%arg0: i32, %arg1: i32, %arg2: i32) -> (i32, i32, i32) {
    %c0_i32 = arith.constant 0 : i32
    return %arg0, %arg2, %arg1 : i32, i32, i32
  }
}

</mosaic_0001>

<bundles_post_ra>
// kernel: tpu_custom_call.1
= control target key start
LH: loop header
LB: loop body
LE: loop exit
PB: predicated region body
PF: predicated region fallthrough
CT: control target
= control target key end

     0   :  { %8 = vsyncpa [#allocation3], 0  ;;  %s1018_s0 = inlined_call_operand.vmem [shape: f32[2,8,1], index: 0, kind: input, shape index: {}]   ;;  %s1019_s1 = inlined_call_operand.vmem [shape: bf16[2,8,128], index: 1, kind: input, shape index: {}]   ;;  %s1020_s2 = inlined_call_operand.hbm [shape: bf16[2,128,256], index: 2, kind: input, shape index: {}]   ;;  %s1021_s3 = inlined_call_operand.hbm [shape: f32[2,8,256], index: 3, kind: output, shape index: {}]  }
   0x1   :  { %10 = vsyncpa [#allocation3 + $0x1], 0 }
   0x2   :  { %11 = vsyncpa [#allocation4], 0 }
   0x3   :  { %13 = vsyncpa [#allocation4 + $0x1], 0  ;;  %s851_s12 = smov 0   ;;  %s853_s13 = smov 0  }
   0x4   :  { %s855_s14 = smov 0   ;;  %s857_s15 = smov 0  }
   0x5   :  { %s859_s16 = smov 0   ;;  %s861_s17 = smov 0  }
   0x6 LB: > { %s549_s18 = sadd.s32 4294967295, %s826_s17   ;;  %s550_s19 = sadd.s32 4294967294, %s826_s17   ;;  %s826_s17 = sphi %s861_s17, %s19_s17   ;;  %s822_s16 = sphi %s859_s16, %s1030_s16   ;;  %s818_s15 = sphi %s857_s15, %s1029_s15   ;;  %s814_s14 = sphi %s855_s14, %s1028_s14   ;;  %s810_s13 = sphi %s853_s13, %s1027_s13   ;;  %s806_s12 = sphi %s851_s12, %s1026_s12  }
   0x7   : > { %s38_s20 = sadd.s32 1, %s822_s16  ;;  %s103_s21 = sadd.s32 1, %s814_s14 }
   0x8   : > { %p40_p0 = scmp.ge.s32.totalorder %s38_s20, 2  ;;  %p110_p1 = scmp.ne.s32.totalorder %s814_s14, %s810_s13 }
   0x9   : > { %p111_p2 = scmp.eq.s32.totalorder %s826_s17, 0  ;;  %p116_p3 = scmp.ne.s32.totalorder %s810_s13, %s806_s12 }
   0xa   : > { %s1032_s20 = smov (%p40_p0, %s38_s20), 0  ;;  %p117_p5 = scmp.eq.s32.totalorder %s549_s18, 0 }
   0xb   : > { %p892_p4 = por %p111_p2, %p110_p1  ;;  %s98_s23 = ssub.s32 %s822_s16, %s1032_s20 }
   0xc   : > { %p144_p6 = scmp.eq.s32.totalorder %s549_s18, 1  ;;  %p101_p7 = scmp.eq.s32.totalorder %s98_s23, 0 }
   0xd   : > { %p898_p8 = por %p117_p5, %p116_p3  ;;  %p150_p10 = scmp.eq.s32.totalorder %s550_s19, 1 }
   0xe   : > { %p902_p9 = por %p144_p6, %p110_p1  ;;  %p552_p12 = scmp.ge.s32.totalorder %s826_s17, 2 }
   0xf   : > { %s907_s26 = scalar_select %p101_p7, %s814_s14, %s103_s21  }
  0x10   : > { %p909_p11 = por %p150_p10, %p116_p3  ;;  %p660_p13 = scmp.lt.s32.totalorder %s826_s17, 2 }
  0x11   : > { %s190_s28 = sand.u32 1, %s814_s14   ;;  %s630_s30 = sshll.u32 %s822_s16, 7 }
  0x12   : > { %s553_s29 = sshll.u32 %s190_s28, 7  ;;  %s201_s6 = scalar_lea.hbm %s1020_s2, %s630_s30 }
  0x13   : > { %s194_s7 = scalar_lea.vmem [#allocation2], %s553_s29  ;;  %s202_s9 = sshll.u32 %s201_s6, 4  ;;  %s203_s9 = int_to_ptr.hbm [resolvable:$true] %s202_s9 }
  0x14   : > { %s204_s8 = sshll.u32 %s194_s7, 4  ;;  %p653_p0 = pnand %p660_p13, %p892_p4  ;;  %s205_s8 = int_to_ptr.vmem [resolvable:$true] %s204_s8 }
  0x15   : > { %p556_p1 = scmp.ge.s32.totalorder %s826_s17, 1  ;;  %s191_s10 = scalar_lea.sflag [#allocation3], %s190_s28 }
  0x16   : > { %s828_s11 = smov 128   ;;  %s829_s18 = smov 8  }
  0x17   : > { %655 = dma.hbm_to_vmem [thread:$0]  (!%p653_p0), %s203_s9, 2048, %s205_s8, %s191_s10, %s828_s11, %s828_s11, %s829_s18  }
  0x18   : > { %p212_p2 = scmp.lt.s32.totalorder %s826_s17, 3 }
  0x1a   : > { %p213_p3 = pnand %p556_p1, %p212_p2 }
  0x1b   : > { %s925_s19 = sand.u32 (!%p213_p3), 1, %s810_s13  }
  0x1c   : > { %216 = sbr.rel (%p213_p3) target bundleno = 203 (0xcb), region = 32  ;;  %s557_s21 = sshll.u32 (!%p213_p3), %s925_s19, 7 }
  0x1d   : > { %s219_s23 = scalar_lea.sflag (!%p213_p3), [#allocation3], %s925_s19  ;;  %s929_s29 = scalar_lea.vmem (!%p213_p3), [#allocation2], %s557_s21 }
  0x21   : > { %797 = dma.done.wait (%p898_p8), %s219_s23, 2048  }
  0x22   : > { %799 = vsyncadd (%p898_p8), %s219_s23, 4294965248  ;;  %p260_p4 = scmp.lt.s32.totalorder %s818_s15, 1  ;;  %v619_v0 = vld [vmem:[%s929_s29 + $0x70] sm:$0xf]  ;;  %v646_v1 = vld [vmem:[%s929_s29 + $0x74] sm:$0xf0] }
  0x23   : > { %v645_v2 = vld [vmem:[%s929_s29 + $0x74] sm:$0xf]  ;;  %v620_v3 = vor.u32 %v646_v1, %v619_v0  ;;  %v621_v4 = vld [vmem:[%s929_s29 + $0x78] sm:$0xf0]  ;;  %v611_v5 = vld [vmem:[%s929_s29 + $0x60] sm:$0xf] }
  0x24   : > { %v644_v6 = vld [vmem:[%s929_s29 + $0x64] sm:$0xf0]  ;;  %v624_v7 = vor.u32 %v645_v2, %v621_v4  ;;  %v643_v8 = vld [vmem:[%s929_s29 + $0x64] sm:$0xf]  ;;  %v613_v9 = vld [vmem:[%s929_s29 + $0x68] sm:$0xf0] }
  0x25   : > { %373 = vmatpush.bf16.msra.mxu0 %v620_v3  ;;  %v612_v10 = vor.u32 %v644_v6, %v611_v5  ;;  %s945_s22 = scalar_select %p260_p4, %s818_s15, 1  ;;  %v616_v11 = vor.u32 %v643_v8, %v613_v9  ;;  %v603_v12 = vld [vmem:[%s929_s29 + $0x50] sm:$0xf]  ;;  %v642_v13 = vld [vmem:[%s929_s29 + $0x54] sm:$0xf0]  ;;  %v830_v27 = vmov 0  }
  0x26   : > { %386 = vmatpush.bf16.msra.mxu1 %v624_v7  ;;  %v641_v14 = vld [vmem:[%s929_s29 + $0x54] sm:$0xf]  ;;  %v605_v15 = vld [vmem:[%s929_s29 + $0x58] sm:$0xf0]  ;;  %v604_v16 = vor.u32 %v642_v13, %v603_v12  ;;  %v595_v18 = vld [vmem:[%s929_s29 + $0x40] sm:$0xf]  ;;  %713 = vset.pattern.permute.xlu0 %v830_v27 }
  0x27   : > { %s559_s24 = sshll.u32 %s945_s22, 3  ;;  %v608_v17 = vor.u32 %v641_v14, %v605_v15  ;;  %v640_v19 = vld [vmem:[%s929_s29 + $0x44] sm:$0xf0]  ;;  %v639_v20 = vld [vmem:[%s929_s29 + $0x44] sm:$0xf]  ;;  %s560_s5 = sshll.u32 %s945_s22, 2 }
  0x28   : > { %s266_s4 = scalar_lea.vmem %s1018_s0, %s559_s24  ;;  %v597_v21 = vld [vmem:[%s929_s29 + $0x48] sm:$0xf0]  ;;  %v596_v22 = vor.u32 %v640_v19, %v595_v18  ;;  %v587_v25 = vld [vmem:[%s929_s29 + $0x30] sm:$0xf]  ;;  %v638_v26 = vld [vmem:[%s929_s29 + $0x34] sm:$0xf0]  ;;  %s273_s8 = scalar_lea.vmem %s1019_s1, %s560_s5 }
  0x29   : > { %374 = vmatpush.bf16.msra.mxu0 %v612_v10  ;;  %v399_v23 = vld [vmem:[%s266_s4] sm:$0xff]  ;;  %v600_v24 = vor.u32 %v639_v20, %v597_v21  ;;  %v637_v28 = vld [vmem:[%s929_s29 + $0x34] sm:$0xf]  ;;  %v589_v29 = vld [vmem:[%s929_s29 + $0x38] sm:$0xf0]  ;;  %v588_v30 = vor.u32 %v638_v26, %v587_v25  ;;  %s647_s9 = sshll.u32 %s818_s15, 4 }
  0x2a   : > { %387 = vmatpush.bf16.msra.mxu1 %v616_v11  ;;  %402 = vperm.xlu0 %713, %v399_v23   ;;  %v592_v31 = vor.u32 %v637_v28, %v589_v29  ;;  %v579_v32 = vld [vmem:[%s929_s29 + $0x20] sm:$0xf]  ;;  %v636_v33 = vld [vmem:[%s929_s29 + $0x24] sm:$0xf0]  ;;  %v635_v34 = vld [vmem:[%s929_s29 + $0x24] sm:$0xf]  ;;  %s425_s21 = scalar_lea.hbm %s1021_s3, %s647_s9 }
  0x2b   : > { %v581_v35 = vld [vmem:[%s929_s29 + $0x28] sm:$0xf0]  ;;  %v580_v36 = vor.u32 %v636_v33, %v579_v32  ;;  %v571_v38 = vld [vmem:[%s929_s29 + $0x10] sm:$0xf]  ;;  %v634_v39 = vld [vmem:[%s929_s29 + $0x14] sm:$0xf0] }
  0x2c   : > { %v584_v37 = vor.u32 %v635_v34, %v581_v35  ;;  %v633_v40 = vld [vmem:[%s929_s29 + $0x14] sm:$0xf]  ;;  %v573_v41 = vld [vmem:[%s929_s29 + $0x18] sm:$0xf0]  ;;  %v572_v42 = vor.u32 %v634_v39, %v571_v38  ;;  %v563_v44 = vld [vmem:[%s929_s29] sm:$0xf] }
  0x2d   : > { %375 = vmatpush.bf16.msra.mxu0 %v604_v16  ;;  %v576_v43 = vor.u32 %v633_v40, %v573_v41  ;;  %v632_v45 = vld [vmem:[%s929_s29 + $0x4] sm:$0xf0]  ;;  %v631_v46 = vld [vmem:[%s929_s29 + $0x4] sm:$0xf]  ;;  %v565_v47 = vld [vmem:[%s929_s29 + $0x8] sm:$0xf0] }
  0x2e   : > { %388 = vmatpush.bf16.msra.mxu1 %v608_v17  ;;  %v564_v48 = vor.u32 %v632_v45, %v563_v44  ;;  %v568_v49 = vor.u32 %v631_v46, %v565_v47  ;;  %v276_v50 = vld [vmem:[%s273_s8] sm:$0xf]  ;;  %s558_s10 = sshll.u32 %s925_s19, 4  ;;  %s429_s22 = sshll.u32 %s425_s21, 4  ;;  %s430_s22 = int_to_ptr.hbm [resolvable:$true] %s429_s22 }
  0x2f   : > { %s259_s23 = scalar_lea.vmem [#allocation5], %s558_s10  ;;  %s410_s24 = scalar_lea.sflag [#allocation4], %s925_s19 }
  0x30   : > { %s427_s29 = sshll.u32 %s259_s23, 4  ;;  %s758_s15 = sshra.s32 %s430_s22, 4  ;;  %s428_s29 = int_to_ptr.vmem [resolvable:$true] %s427_s29  ;;  %s759_s15 = int_to_ptr.hbm [resolvable:$true] %s758_s15 }
  0x31   : > { %376 = vmatpush.bf16.msra.mxu0 %v596_v22  ;;  %s760_s28 = scalar_lea.hbm %s759_s15, 16  ;;  %s764_s5 = scalar_lea.hbm %s1021_s3, 32 }
  0x32   : > { %389 = vmatpush.bf16.msra.mxu1 %v600_v24  ;;  %p761_p5 = scmp.ne.s32.totalorder %s759_s15, %s760_s28  ;;  %p765_p8 = scmp.lt.s32.totalorder %s759_s15, %s1021_s3 }
  0x33   : > { %p766_p10 = scmp.lt.s32.totalorder %s764_s5, %s760_s28 }
  0x34   : > { %p762_p6 = pnand %p761_p5, %p902_p9 }
  0x35   : > { %377 = vmatpush.bf16.msra.mxu0 %v588_v30  ;;  %p767_p13 = por %p766_p10, %p765_p8 }
  0x36   : > { %390 = vmatpush.bf16.msra.mxu1 %v592_v31  ;;  %p763_p7 = pneg %p762_p6 }
  0x38   : > { %p768_p0 = pnand %p767_p13, %p763_p7 }
  0x39   : > { %378 = vmatpush.bf16.msra.mxu0 %v580_v36 }
  0x3a   : > { %391 = vmatpush.bf16.msra.mxu1 %v584_v37 }
  0x3d   : > { %379 = vmatpush.bf16.msra.mxu0 %v572_v42 }
  0x3e   : > { %392 = vmatpush.bf16.msra.mxu1 %v576_v43 }
  0x41   : > { %380 = vmatpush.bf16.msra.mxu0 %v564_v48 }
  0x42   : > { %393 = vmatpush.bf16.msra.mxu1 %v568_v49 }
  0x44   : > { %381 = vmatmul.bf16.vlgmr.msra.gmra.mxu0 %v276_v50 }
  0x45   : > { %394 = vmatmul.bf16.vlgmr.msra.gmra.mxu1 %v276_v50 }
  0x9c   : > { %v403_v51 = vpop.permute.xlu0 %402 }
  0xc1   : > { %v382_v52 = vpop.f32.mrf.mxu0 }
  0xc2   : > { %v405_v53 = vmul.f32 %v403_v51, %v382_v52  ;;  %v395_v54 = vpop.f32.mrf.mxu1 }
  0xc3   : > { %v406_v55 = vmul.f32 %v403_v51, %v395_v54 }
  0xc4   : > { %407 = vst [vmem:[%s259_s23] sm:$0xff] %v405_v53 }
  0xc5   : > { %408 = vst [vmem:[%s259_s23 + $0x8] sm:$0xff] %v406_v55 }
  0xc6   : > { %771 = shalt.err (!%p768_p0)
}
  0xc7   : > { %650 = dma.vmem_to_hbm [thread:$0]  (%p902_p9), %s428_s29, 256, %s430_s22, %s410_s24  }
  0xc9   : > { %v384_v56 = vpop.f32.mrf.mxu0 }
  0xca   : > { %v397_v57 = vpop.f32.mrf.mxu1 }
  0xcb PF: > { %s441_s19 = sand.u32 1, %s806_s12   ;;  %p657_p1 = pnand %p552_p12, %p909_p11 }
  0xcc   : > { %s442_s8 = scalar_lea.sflag [#allocation4], %s441_s19 }
  0xcd   : > { %p658_p2 = pneg %p657_p1 }
  0xcf   : > { %801 = dma.done.wait (%p658_p2), %s442_s8, 256  }
  0xd0   : > { %803 = vsyncadd (%p658_p2), %s442_s8, 4294967040  ;;  %s19_s17 = sadd.s32 1, %s826_s17   ;;  %s1026_s12 = smov %s810_s13 }
  0xd1   : > { %p16_p3 = scmp.ge.s32.totalorder %s19_s17, 4   ;;  %s1027_s13 = smov %s814_s14 }
  0xd2   : > { %s1028_s14 = smov %s907_s26  ;;  %s1029_s15 = smov %s822_s16 }
  0xd3   : > { %s1030_s16 = smov %s1032_s20  ;;  %18 = sbr.rel (!%p16_p3) target bundleno = 6 (0x6), region = 83 }
  0xd8   :  { %448 = vsyncpa [#allocation3], 1 }
  0xd9   :  { %450 = vsyncpa [#allocation3 + $0x1], 1 }
  0xda   :  { %451 = vsyncpa [#allocation4], 1 }
  0xdb   :  { %453 = vsyncpa [#allocation4 + $0x1], 1 }

</bundles_post_ra>
